<compile_context>
chip_gen: v6e
topology: v6e:2x2x1
jax: 0.10.0
libtpu: 0.0.40
codegen_flags: <defaults>
</compile_context>

<pallas_src>
import functools

import jax
import jax.numpy as jnp
import numpy as np
from jax import lax
from jax.experimental import pallas as pl
from jax.experimental.pallas import tpu as pltpu


def _choose_tile(l: int, max_tile: int = 16384) -> int:
    """Lane-tile along L: a multiple of 128 dividing L (capped), else full L."""
    if l <= max_tile:
        return l
    if l % 128 == 0:
        t = (max_tile // 128) * 128
        while t > 0 and l % t != 0:
            t -= 128
        if t > 0:
            return t
    # TODO(synk): ragged L > max_tile could use pl.cdiv + in-kernel masking.
    return l


# ------------------------------ Pallas kernel ------------------------------
def _seq_embedding_kernel(tok_ref, oh_ref, wt_ref, out_ref, *, emb_dim):
    # tok_ref/oh_ref: (1, 1, TILE_L) int  -- token ids / class ids for this tile
    # wt_ref        : (E, V) f32          -- transposed embedding table (resident)
    # out_ref       : (1, D, TILE_L) f32  -- channels-first output tile, D = E + C
    tile_l = out_ref.shape[2]
    num_classes = out_ref.shape[1] - emb_dim
    vocab = wt_ref.shape[1]

    tok = tok_ref[0].astype(jnp.int32)   # (1, TILE_L), widen in-kernel if narrow
    oh = oh_ref[0].astype(jnp.int32)     # (1, TILE_L)

    # Token branch: tiny-vocab lookup as one-hot @ W^T on the MXU.
    # Single iota compare per row (VPU), one matmul, one sublane-aligned store.
    iota_v = lax.broadcasted_iota(jnp.int32, (vocab, tile_l), 0)
    onehot_tok = (iota_v == tok).astype(jnp.float32)              # (V, TILE_L)
    emb = jnp.dot(wt_ref[...], onehot_tok,
                  preferred_element_type=jnp.float32)             # (E, TILE_L)
    out_ref[0, :emb_dim, :] = emb

    # One-hot branch: class channels written straight from an iota compare
    # (no matmul, no concat); negative / OOR class ids give zeros.
    iota_c = lax.broadcasted_iota(jnp.int32, (num_classes, tile_l), 0)
    out_ref[0, emb_dim:, :] = (iota_c == oh).astype(jnp.float32)  # (C, TILE_L)


# ------------------------------- wrapper ------------------------------------
def seq_embedding(x_tok, x_oh, weight, num_classes, *, max_tile_l=16384):
    """x_tok, x_oh: (B, L) int.  weight: (V, E) f32.  Returns (B, E+C, L) f32."""
    B, L = x_tok.shape
    V, E = weight.shape
    C = int(num_classes)
    D = E + C

    tile_l = _choose_tile(L, max_tile_l)
    grid = (B, L // tile_l)

    # Free metadata reshapes (no HBM pass) so the last two block dims are
    # (1, TILE_L) against full array dims (1, L).
    tok3 = x_tok.reshape(B, 1, L)
    oh3 = x_oh.reshape(B, 1, L)
    # TODO(synk): precompute weight.T once at parameter-init time (tiny: V x E).
    w_t = weight.T.astype(jnp.float32)   # (E, V)

    kernel = functools.partial(_seq_embedding_kernel, emb_dim=E)

    return pl.pallas_call(
        kernel,
        out_shape=jax.ShapeDtypeStruct((B, D, L), jnp.float32),
        grid=grid,
        in_specs=[
            pl.BlockSpec((1, 1, tile_l), lambda b, l: (b, 0, l)),   # token ids
            pl.BlockSpec((1, 1, tile_l), lambda b, l: (b, 0, l)),   # class ids
            pl.BlockSpec((E, V), lambda b, l: (0, 0)),              # W^T, resident
        ],
        out_specs=pl.BlockSpec((1, D, tile_l), lambda b, l: (b, 0, l)),
        compiler_params=pltpu.CompilerParams(
            dimension_semantics=("parallel", "parallel")),
    )(tok3, oh3, w_t)


# ------------------------------ reference ----------------------------------
def seq_embedding_ref(x_tok, x_oh, weight, num_classes):
    emb_tok = weight[x_tok]                                          # (B, L, E)
    emb_oh = jax.nn.one_hot(x_oh, num_classes, dtype=jnp.float32)    # (B, L, C)
    emb = jnp.concatenate([emb_tok, emb_oh], axis=-1)                # (B, L, D)
    return jnp.transpose(emb, (0, 2, 1))                             # (B, D, L)


# --------------------------------- main -------------------------------------
if __name__ == "__main__":
    key = jax.random.PRNGKey(0)
    k_tok, k_oh, k_w, k_tok2, k_oh2 = jax.random.split(key, 5)

    # small shapes consistent with the module
    B, L = 2, 16        # batch, sequence length
    V, E = 16, 8        # nn.Embedding: num_embeddings, embedding_dim
    C = 4               # OneHotEncoding: num_classes
    D = E + C

    x_tok = jax.random.randint(k_tok, (B, L), 0, V, dtype=jnp.int32)
    x_oh = jax.random.randint(k_oh, (B, L), 0, C, dtype=jnp.int32)
    weight = jax.random.normal(k_w, (V, E), dtype=jnp.float32)  # nn.Embedding ~ N(0,1)

    out = seq_embedding(x_tok, x_oh, weight, num_classes=C)
    out = jax.block_until_ready(out)
    ref = seq_embedding_ref(x_tok, x_oh, weight, C)
    np.testing.assert_allclose(np.asarray(out), np.asarray(ref), rtol=1e-6, atol=1e-6)
    assert out.shape == (B, D, L) and out.dtype == jnp.float32

    # second check: multi-tile grid (exercises L tiling + resident weight table)
    B2, L2 = 4, 256
    x_tok2 = jax.random.randint(k_tok2, (B2, L2), 0, V, dtype=jnp.int32)
    x_oh2 = jax.random.randint(k_oh2, (B2, L2), 0, C, dtype=jnp.int32)
    out2 = seq_embedding(x_tok2, x_oh2, weight, num_classes=C, max_tile_l=128)
    out2 = jax.block_until_ready(out2)
    ref2 = seq_embedding_ref(x_tok2, x_oh2, weight, C)
    np.testing.assert_allclose(np.asarray(out2), np.asarray(ref2), rtol=1e-6, atol=1e-6)

    print("KERNEL_OK")
</pallas_src>

<mosaic_0001>
module attributes {stable_mosaic.version = 11 : i64} {
  func.func @_seq_embedding_kernel(%arg0: i32, %arg1: i32, %arg2: memref<1x1x16xi32, #tpu.memory_space<vmem>>, %arg3: memref<1x1x16xi32, #tpu.memory_space<vmem>>, %arg4: memref<8x16xf32, #tpu.memory_space<vmem>>, %arg5: memref<1x12x16xf32, #tpu.memory_space<vmem>>) attributes {dimension_semantics = [#tpu.dimension_semantics<parallel>, #tpu.dimension_semantics<parallel>], iteration_bounds = array<i64: 2, 1>, scalar_prefetch = 0 : i64, scratch_operands = 0 : i64, tpu.core_type = #tpu.core_type<tc>, window_params = [{transform_indices = @transform_0, window_bounds = array<i64: 1, 1, 16>}, {transform_indices = @transform_1, window_bounds = array<i64: 1, 1, 16>}, {pipeline_mode = #tpu.pipeline_mode<synchronous>, transform_indices = @transform_2, window_bounds = array<i64: 8, 16>}, {transform_indices = @transform_3, window_bounds = array<i64: 1, 12, 16>}]} {
    %c0 = arith.constant 0 : index
    %c0_0 = arith.constant 0 : index
    %c0_1 = arith.constant 0 : index
    %0 = vector.load %arg2[%c0, %c0_0, %c0_1] : memref<1x1x16xi32, #tpu.memory_space<vmem>>, vector<1x1x16xi32>
    %1 = vector.shape_cast %0 : vector<1x1x16xi32> to vector<1x16xi32>
    %c0_2 = arith.constant 0 : index
    %c0_3 = arith.constant 0 : index
    %c0_4 = arith.constant 0 : index
    %2 = vector.load %arg3[%c0_2, %c0_3, %c0_4] : memref<1x1x16xi32, #tpu.memory_space<vmem>>, vector<1x1x16xi32>
    %3 = vector.shape_cast %2 : vector<1x1x16xi32> to vector<1x16xi32>
    %4 = tpu.iota {dimensions = array<i32: 0>} : vector<16x16xi32>
    %5 = vector.broadcast %1 : vector<1x16xi32> to vector<16x16xi32>
    %6 = arith.cmpi eq, %4, %5 : vector<16x16xi32>
    %7 = arith.extui %6 : vector<16x16xi1> to vector<16x16xi32>
    %8 = arith.sitofp %7 : vector<16x16xi32> to vector<16x16xf32>
    %c0_5 = arith.constant 0 : index
    %c0_6 = arith.constant 0 : index
    %9 = vector.load %arg4[%c0_5, %c0_6] : memref<8x16xf32, #tpu.memory_space<vmem>>, vector<8x16xf32>
    %cst = arith.constant dense<0.000000e+00> : vector<8x16xf32>
    %10 = tpu.matmul %9, %8, %cst {dimension_numbers = #tpu.dot_dimension_numbers<[1], [0], [0], [1], [0, 0, 1, 1], [], []>} : vector<8x16xf32>, vector<16x16xf32>, vector<8x16xf32> -> vector<8x16xf32>
    %c0_7 = arith.constant 0 : index
    %c0_8 = arith.constant 0 : index
    %c0_9 = arith.constant 0 : index
    %11 = vector.load %arg5[%c0_7, %c0_8, %c0_9] : memref<1x12x16xf32, #tpu.memory_space<vmem>>, vector<1x8x16xf32>
    %12 = vector.shape_cast %11 : vector<1x8x16xf32> to vector<8x16xf32>
    %13 = vector.shape_cast %10 : vector<8x16xf32> to vector<1x8x16xf32>
    tpu.vector_store %arg5[%c0_7, %c0_8, %c0_9], %13 {strides = array<i32>} : memref<1x12x16xf32, #tpu.memory_space<vmem>>, vector<1x8x16xf32>,
    %14 = tpu.iota {dimensions = array<i32: 0>} : vector<4x16xi32>
    %15 = vector.broadcast %3 : vector<1x16xi32> to vector<4x16xi32>
    %16 = arith.cmpi eq, %14, %15 : vector<4x16xi32>
    %17 = arith.extui %16 : vector<4x16xi1> to vector<4x16xi32>
    %18 = arith.sitofp %17 : vector<4x16xi32> to vector<4x16xf32>
    %c0_10 = arith.constant 0 : index
    %c8 = arith.constant 8 : index
    %c0_11 = arith.constant 0 : index
    %19 = vector.load %arg5[%c0_10, %c8, %c0_11] : memref<1x12x16xf32, #tpu.memory_space<vmem>>, vector<1x4x16xf32>
    %20 = vector.shape_cast %19 : vector<1x4x16xf32> to vector<4x16xf32>
    %21 = vector.shape_cast %18 : vector<4x16xf32> to vector<1x4x16xf32>
    tpu.vector_store %arg5[%c0_10, %c8, %c0_11], %21 {strides = array<i32>} : memref<1x12x16xf32, #tpu.memory_space<vmem>>, vector<1x4x16xf32>,
    return
  }
  func.func @transform_0(%arg0: i32, %arg1: i32) -> (i32, i32, i32) {
    %c0_i32 = arith.constant 0 : i32
    %c0_i32_0 = arith.constant 0 : i32
    return %arg0, %c0_i32, %arg1 : i32, i32, i32
  }
  func.func @transform_1(%arg0: i32, %arg1: i32) -> (i32, i32, i32) {
    %c0_i32 = arith.constant 0 : i32
    %c0_i32_0 = arith.constant 0 : i32
    return %arg0, %c0_i32, %arg1 : i32, i32, i32
  }
  func.func @transform_2(%arg0: i32, %arg1: i32) -> (i32, i32) {
    %c0_i32 = arith.constant 0 : i32
    %c0_i32_0 = arith.constant 0 : i32
    %c0_i32_1 = arith.constant 0 : i32
    return %c0_i32, %c0_i32_0 : i32, i32
  }
  func.func @transform_3(%arg0: i32, %arg1: i32) -> (i32, i32, i32) {
    %c0_i32 = arith.constant 0 : i32
    %c0_i32_0 = arith.constant 0 : i32
    return %arg0, %c0_i32, %arg1 : i32, i32, i32
  }
}

</mosaic_0001>

<bundles_post_ra>
// kernel: tpu_custom_call.1
= control target key start
LH: loop header
LB: loop body
LE: loop exit
PB: predicated region body
PF: predicated region fallthrough
CT: control target
= control target key end

     0   :  { %8 = vsyncpa [#allocation3], 0  ;;  %s897_s0 = inlined_call_operand.hbm [shape: s32[2,1,16], index: 0, kind: input, shape index: {}]   ;;  %s898_s1 = inlined_call_operand.hbm [shape: s32[2,1,16], index: 1, kind: input, shape index: {}]   ;;  %s899_s2 = inlined_call_operand.hbm [shape: f32[8,16], index: 2, kind: input, shape index: {}]   ;;  %s900_s3 = inlined_call_operand.vmem [shape: f32[2,12,16], index: 3, kind: output, shape index: {}]  }
   0x1   :  { %10 = vsyncpa [#allocation3 + $0x1], 0 }
   0x2   :  { %11 = vsyncpa [#allocation5], 0 }
   0x3   :  { %13 = vsyncpa [#allocation5 + $0x1], 0  ;;  %s748_s12 = smov 0   ;;  %s750_s13 = smov 0  }
   0x4   :  { %s752_s14 = smov 0   ;;  %s754_s15 = smov 0  }
   0x5   :  { %s756_s16 = smov 0   ;;  %s758_s17 = smov 0  }
   0x6 LB: > { %s474_s18 = sadd.s32 4294967295, %s720_s17   ;;  %p53_p1 = scmp.ne.s32.totalorder %s704_s13, %s700_s12  ;;  %s720_s17 = sphi %s758_s17, %s19_s17   ;;  %s716_s16 = sphi %s756_s16, %s913_s16   ;;  %s712_s15 = sphi %s754_s15, %s912_s15   ;;  %s708_s14 = sphi %s752_s14, %s911_s14   ;;  %s704_s13 = sphi %s750_s13, %s910_s13   ;;  %s700_s12 = sphi %s748_s12, %s909_s12  }
   0x7   : > { %p782_p2 = scmp.eq.s32.totalorder %s474_s18, 0  ;;  %p476_p3 = scmp.ge.s32.totalorder %s720_s17, 1 }
   0x8   : > { %p141_p4 = scmp.lt.s32.totalorder %s720_s17, 3  ;;  %s722_s22 = smov [#allocation6]  }
   0x9   : > { %p790_p5 = por %p782_p2, %p53_p1  ;;  %s154_s23 = sshll.u32 %s722_s22, 4  ;;  %s155_s23 = int_to_ptr.vmem [resolvable:$true] %s154_s23 }
   0xa   : > { %p794_p6 = pnand %p476_p3, %p141_p4  ;;  %s40_s24 = sadd.s32 1, %s708_s14 }
   0xb   : > { %s903_s20 = scalar_select %p790_p5, 1, 0 }
   0xc   : > { %p514_p7 = pneg %p794_p6  ;;  %s31_s26 = sadd.s32 1, %s716_s16 }
   0xd   : > { %p48_p9 = scmp.eq.s32.totalorder %s720_s17, 0  ;;  %p33_p10 = scmp.ge.s32.totalorder %s31_s26, 2 }
   0xe   : > { %p803_p8 = pnand %p514_p7, %p782_p2  ;;  %s591_s27 = scalar_lea.vmem %s155_s23, 128 }
   0xf   : > { %p592_p12 = scmp.ne.s32.totalorder %s155_s23, %s591_s27  ;;  %p599_p3 = scmp.lt.s32.totalorder %s155_s23, %s155_s23 }
  0x10   : > { %p582_p11 = pneg %p803_p8  ;;  %p600_p4 = scmp.lt.s32.totalorder %s591_s27, %s591_s27 }
  0x12   : > { %p594_p13 = pnand %p592_p12, %p582_p11  ;;  %p601_p0 = por %p600_p4, %p599_p3 }
  0x14   : > { %p595_p1 = pneg %p594_p13 }
  0x16   : > { %p602_p5 = pnand %p601_p0, %p595_p1 }
  0x18   : > { %605 = shalt.err (!%p602_p5)
}
  0x19   : > { %517 = dma.hbm_to_vmem [thread:$0]  (!%p803_p8), %s899_s2, 128, %s155_s23, [#allocation5]  }
  0x1a   : > { %s915_s26 = smov (%p33_p10, %s31_s26), 0  ;;  %p906_p7 = scmp.ne.s32.totalorder %s708_s14, %s704_s13 }
  0x1b   : > { %p526_p5 = scmp.lt.s32.totalorder %s720_s17, 2  ;;  %s35_s30 = ssub.s32 %s716_s16, %s915_s26 }
  0x1c   : > { %p49_p0 = por %p48_p9, %p906_p7  ;;  %s165_s4 = sand.u32 1, %s708_s14  }
  0x1d   : > { %p38_p11 = scmp.eq.s32.totalorder %s35_s30, 0  ;;  %s479_s5 = sshll.u32 %s716_s16, 4 }
  0x1e   : > { %s174_s9 = scalar_lea.hbm %s897_s0, %s479_s5  ;;  %s168_s10 = scalar_lea.vmem [#allocation2], %s165_s4 }
  0x1f   : > { %s829_s6 = scalar_select %p38_p11, %s708_s14, %s40_s24  }
  0x20   : > { %s176_s11 = sshll.u32 %s168_s10, 4  ;;  %p834_p8 = pnand %p526_p5, %p49_p0  ;;  %s177_s11 = int_to_ptr.vmem [resolvable:$true] %s176_s11 }
  0x21   : > { %s183_s22 = sand.u32 1, %s720_s17   ;;  %s842_s27 = scalar_lea.hbm %s898_s1, %s479_s5 }
  0x22   : > { %s166_s24 = scalar_lea.sflag [#allocation3], %s165_s4  ;;  %p608_p9 = pneg %p834_p8 }
  0x23   : > { %s619_s28 = scalar_lea.vmem %s177_s11, 16  ;;  %s723_s29 = smov [#allocation2]  }
  0x24   : > { %p620_p10 = scmp.ne.s32.totalorder %s177_s11, %s619_s28  ;;  %s624_s30 = sshll.u32 %s723_s29, 4  ;;  %s625_s30 = int_to_ptr.vmem [resolvable:$false] %s624_s30 }
  0x25   : > { %s626_s7 = scalar_lea.vmem %s625_s30, 32  ;;  %p627_p1 = scmp.lt.s32.totalorder %s177_s11, %s625_s30 }
  0x26   : > { %p622_p12 = pnand %p620_p10, %p608_p9  ;;  %p628_p3 = scmp.lt.s32.totalorder %s626_s7, %s619_s28 }
  0x28   : > { %p623_p13 = pneg %p622_p12  ;;  %p629_p4 = por %p628_p3, %p627_p1 }
  0x2a   : > { %p630_p7 = pnand %p629_p4, %p623_p13 }
  0x2c   : > { %633 = shalt.err (!%p630_p7)
}
  0x2d   : > { %521 = dma.hbm_to_vmem [thread:$0]  (!%p834_p8), %s174_s9, 16, %s177_s11, %s166_s24  }
  0x2e   : > { %s186_s5 = scalar_lea.vmem [#allocation4], %s165_s4  ;;  %s184_s10 = scalar_lea.sflag [#allocation5], %s183_s22 }
  0x2f   : > { %s194_s8 = sshll.u32 %s186_s5, 4  ;;  %s724_s25 = smov [#allocation4]   ;;  %s195_s8 = int_to_ptr.vmem [resolvable:$true] %s194_s8 }
  0x30   : > { %s647_s23 = scalar_lea.vmem %s195_s8, 16  ;;  %s652_s29 = sshll.u32 %s724_s25, 4  ;;  %s653_s29 = int_to_ptr.vmem [resolvable:$false] %s652_s29 }
  0x31   : > { %p648_p0 = scmp.ne.s32.totalorder %s195_s8, %s647_s23  ;;  %s654_s28 = scalar_lea.vmem %s653_s29, 32 }
  0x32   : > { %p655_p10 = scmp.lt.s32.totalorder %s195_s8, %s653_s29  ;;  %p656_p12 = scmp.lt.s32.totalorder %s654_s28, %s647_s23 }
  0x33   : > { %p650_p5 = pnand %p648_p0, %p608_p9 }
  0x34   : > { %p657_p13 = por %p656_p12, %p655_p10 }
  0x35   : > { %p651_p11 = pneg %p650_p5 }
  0x37   : > { %p658_p1 = pnand %p657_p13, %p651_p11 }
  0x39   : > { %661 = shalt.err (!%p658_p1)
}
  0x3a   : > { %524 = dma.hbm_to_vmem [thread:$0]  (!%p834_p8), %s842_s27, 16, %s195_s8, %s184_s10  }
  0x3b   : > { %203 = sbr.rel (%p794_p6) target bundleno = 275 (0x113), region = 32  ;;  %s205_s4 = sand.u32 (!%p794_p6), 1, %s704_s13  }
  0x3c   : > { %s206_s9 = scalar_lea.sflag (!%p794_p6), [#allocation3], %s205_s4  ;;  %s208_s11 = scalar_lea.vmem (!%p794_p6), [#allocation2], %s205_s4 }
  0x3d   : > { %p908_p9 = scmp.ne.s32.totalorder (!%p794_p6), %s903_s20, 0 }
  0x40   : > { %687 = dma.done.wait (%p908_p9), %s206_s9, 16  }
  0x41   : > { %689 = vsyncadd (%p908_p9), %s206_s9, 4294967280  ;;  %s213_s22 = sand.u32 1, %s474_s18   ;;  %s216_s24 = scalar_lea.vmem [#allocation4], %s205_s4 }
  0x42   : > { %s214_s12 = scalar_lea.sflag [#allocation5], %s213_s22 }
  0x43   : > { %691 = dma.done.wait (%p908_p9), %s214_s12, 16  }
  0x44   : > { %693 = vsyncadd (%p908_p9), %s214_s12, 4294967280 }
  0x45   : > { %695 = dma.done.wait (%p782_p2), [#allocation5], 128  }
  0x46   : > { %697 = vsyncadd (%p782_p2), [#allocation5], 4294967168  ;;  %p249_p6 = scmp.lt.s32.totalorder %s712_s15, 1  ;;  %v259_v0 = vlaneseq  ;;  %v725_v1 = vmov 0.0   ;;  %vm726_vm0 = vmmov 0   ;;  %vm355_vm1 = vcmask 125952  }
  0x47   : > { %499 = vmatprep.subr.mxu0 %v725_v1  ;;  %503 = vmatprep.mubr.msk.f32.mxu0 %vm726_vm0, %v725_v1  ;;  %v491_v4 = vld [vmem:[%s216_s24] ss:$0 sm:$0xff]  ;;  %v727_v7 = vmov 1.0   ;;  %v272_v8 = vld [vmem:[#allocation6] sm:$0xff]  ;;  %vm273_vm5 = vcmask 130048  }
  0x48   : > { %s917_s15 = smov (!%p249_p6, %s712_s15), 1  ;;  %v260_v2 = vshrl.u32 %v259_v0, 7  ;;  %v485_v5 = vld [vmem:[%s208_s11] ss:$0 sm:$0xff] }
  0x49   : > { %s495_s18 = sshll.u32 %s917_s15, 4 }
  0x4a   : > { %v261_v3 = vadd.s32 8, %v260_v2  ;;  %s256_s27 = scalar_lea.vmem %s900_s3, %s495_s18  ;;  %vm352_vm2 = vcmp.eq.s32.totalorder %v260_v2, %v491_v4  ;;  %vm266_vm4 = vcmp.eq.s32.totalorder %v260_v2, %v485_v5 }
  0x4b   : > { %v492_v6 = vsel %vm352_vm2, 1.0, %v725_v1 }
  0x4c   : > { %vm267_vm3 = vcmp.eq.s32.totalorder %v261_v3, %v485_v5  ;;  %356 = vst.msk [vmem:[%s256_s27 + $0x8] sm:$0xf] %vm355_vm1, %v492_v6 }
  0x4d   : > { %500 = vmatpush3.msk.msra.mxu0 %vm267_vm3, %v727_v7 }
  0x4e   : > { %501 = vmatprep.subr.mxu0 %v725_v1 }
  0x4f   : > { %502 = vmatpush3.msk.msra.mxu0 %vm266_vm4, %v727_v7 }
  0x50   : > { %504 = vmatmul.mubr.msk.f32.vlgmr.msra.gmra.mxu0 %vm273_vm5, %v272_v8 }
 0x110   : > { %v343_v9 = vpop.f32.mrf.mxu0 }
 0x111   : > { %347 = vst.msk [vmem:[%s256_s27] sm:$0xff] %vm273_vm5, %v343_v9 }
 0x112   : > { %v505_v10 = vpop.f32.mrf.mxu0 }
 0x113 PF: > { %s19_s17 = sadd.s32 1, %s720_s17   ;;  %s909_s12 = smov %s704_s13 }
 0x114   : > { %p16_p2 = scmp.ge.s32.totalorder %s19_s17, 4   ;;  %s910_s13 = smov %s708_s14 }
 0x115   : > { %s911_s14 = smov %s829_s6  ;;  %s912_s15 = smov %s716_s16 }
 0x116   : > { %s913_s16 = smov %s915_s26  ;;  %18 = sbr.rel (!%p16_p2) target bundleno = 6 (0x6), region = 89 }
 0x11b   :  { %384 = vsyncpa [#allocation3], 1 }
 0x11c   :  { %386 = vsyncpa [#allocation3 + $0x1], 1 }
 0x11d   :  { %387 = vsyncpa [#allocation5], 1 }
 0x11e   :  { %389 = vsyncpa [#allocation5 + $0x1], 1 }

</bundles_post_ra>
